<compile_context>
chip_gen: v7x
topology: tpu7x:2x2x1
jax: 0.10.0
libtpu: 0.0.40
codegen_flags: <defaults>
</compile_context>

<pallas_src>
import jax
import jax.numpy as jnp
import numpy as np
from jax.experimental import pallas as pl
from jax.experimental.pallas import tpu as pltpu

# MiniGrid sizes: 7x7x3 image observation, 7 discrete actions.
H = 7
W = 7
C_IN = 3
A = 7              # action_space.n
A_PAD = 128        # lane-dense padded logits width
ROW_ALIGN = 16     # batch-tile row alignment (bf16 sublane tile)
TB_MAX = 1024      # max rows per grid step


def _round_up(n, m):
    return ((n + m - 1) // m) * m


def _cdiv(a, b):
    return -(-a // b)


# ---------------------------------------------------------------------------
# Kernel: one batch tile of TB samples; bf16 matmuls with f32 accumulation.
# ---------------------------------------------------------------------------
def policy_kernel(x_ref, w1_ref, b1_ref, wt_ref, bt_ref, out_ref):
    x = x_ref[...]                                       # (TB, 147)  bf16
    bt = bt_ref[...]                                     # (4, 128)   f32

    # Conv2d(3,16,(2,2)) + ReLU as a single dense matmul.  Output columns are
    # tap-major: col = (di*2+dj)*256 + (pi*3+pj)*16 + cout  (144 used / 256 per tap).
    a1 = jnp.maximum(
        jnp.dot(x, w1_ref[...], preferred_element_type=jnp.float32)
        + b1_ref[...], 0.0)                              # (TB, 1024) f32

    # MaxPool2d((2,2)): max over the 4 taps = 3 vreg-aligned jnp.maximum ops
    # over 256-lane slabs (slab starts at 0/256/512/768 -> pure VPU, no XLU).
    pooled = jnp.maximum(jnp.maximum(a1[:, 0:256], a1[:, 256:512]),
                         jnp.maximum(a1[:, 512:768], a1[:, 768:1024]))  # (TB,256)

    # Conv2d(16,32,(2,2)) + ReLU: rows of Wtail[0:256] are (pool_pos*16+cin),
    # padded with zeros beyond 144; cols = (i2*2+j2)*32 + cout.
    a2 = jnp.maximum(
        jnp.dot(pooled.astype(jnp.bfloat16), wt_ref[0:256, :],
                preferred_element_type=jnp.float32) + bt[0:1, :], 0.0)  # (TB,128)

    # Conv2d(32,64,(2,2)) + ReLU: kernel covers the full 2x2 extent -> plain
    # matmul, output padded to 128 lanes (pad lanes stay exactly 0).
    a3 = jnp.maximum(
        jnp.dot(a2.astype(jnp.bfloat16), wt_ref[256:384, :],
                preferred_element_type=jnp.float32) + bt[1:2, :], 0.0)  # (TB,128)

    # Actor head: Linear(64,64) -> Tanh -> Linear(64,A), all padded to 128 lanes.
    h = jnp.tanh(
        jnp.dot(a3.astype(jnp.bfloat16), wt_ref[384:512, :],
                preferred_element_type=jnp.float32) + bt[2:3, :])       # (TB,128)
    out_ref[...] = (
        jnp.dot(h.astype(jnp.bfloat16), wt_ref[512:640, :],
                preferred_element_type=jnp.float32) + bt[3:4, :])       # (TB,128)


# ---------------------------------------------------------------------------
# Wrapper
# ---------------------------------------------------------------------------
def policy_forward(x, prepared_params):
    """x: (B, 7, 7, 3) float32 NHWC.  Returns (B, A) float32 logits."""
    W1b, b1b, Wtail, Btail = prepared_params
    B = x.shape[0]

    # Divisor-aware batch tiling: minimal padding, >=2 grid steps when possible
    # (so the "parallel" axis shards across both v7x TensorCores), tiles up to
    # TB_MAX rows to amortize per-step overhead.
    n_tiles = max(_cdiv(B, TB_MAX), min(2, _cdiv(B, ROW_ALIGN)))
    TB = _round_up(_cdiv(B, n_tiles), ROW_ALIGN)
    B_pad = n_tiles * TB

    x_flat = x.reshape(B, H * W * C_IN).astype(jnp.bfloat16)    # (B, 147)
    if B_pad != B:
        x_flat = jnp.pad(x_flat, ((0, B_pad - B), (0, 0)))

    in_specs = [
        pl.BlockSpec((TB, H * W * C_IN), lambda b: (b, 0)),     # batch tile
        pl.BlockSpec(W1b.shape, lambda b: (0, 0)),              # grid-invariant
        pl.BlockSpec(b1b.shape, lambda b: (0, 0)),
        pl.BlockSpec(Wtail.shape, lambda b: (0, 0)),
        pl.BlockSpec(Btail.shape, lambda b: (0, 0)),
    ]

    out = pl.pallas_call(
        policy_kernel,
        out_shape=jax.ShapeDtypeStruct((B_pad, A_PAD), jnp.float32),
        grid_spec=pltpu.PrefetchScalarGridSpec(
            num_scalar_prefetch=0,
            grid=(n_tiles,),
            in_specs=in_specs,
            out_specs=pl.BlockSpec((TB, A_PAD), lambda b: (b, 0)),
            scratch_shapes=[]),
        compiler_params=pltpu.CompilerParams(
            dimension_semantics=("parallel",),
            vmem_limit_bytes=32 * 1024 * 1024),
    )(x_flat, W1b, b1b, Wtail, Btail)
    return out[:B, :A]


def prepare_params(params):
    """Build the dense 'unrolled conv' matrices once, host-side (layout only)."""
    w1, b1, w2, b2, w3, b3, wa1, ba1, wa2, ba2 = (
        np.asarray(p, np.float32) for p in params)

    # Conv1: rows = (r*7 + c)*3 + cin ;
    #        cols = (di*2+dj)*256 + (pi*3+pj)*16 + cout   (tap-major, 256-pad)
    W1b = np.zeros((H * W * C_IN, 4 * 256), np.float32)
    b1b = np.zeros((1, 4 * 256), np.float32)
    for di in range(2):
        for dj in range(2):
            tap = di * 2 + dj
            for pi in range(3):
                for pj in range(3):
                    i, j = 2 * pi + di, 2 * pj + dj
                    col0 = tap * 256 + (pi * 3 + pj) * 16
                    b1b[0, col0:col0 + 16] = b1.reshape(-1)
                    for kh in range(2):
                        for kw in range(2):
                            row0 = ((i + kh) * 7 + (j + kw)) * 3
                            W1b[row0:row0 + 3, col0:col0 + 16] = w1[kh, kw]

    # Conv2: rows = (pi*3+pj)*16 + cin (144 used, zero-padded to 256);
    #        cols = (i2*2+j2)*32 + cout
    W2b = np.zeros((256, 128), np.float32)
    for i2 in range(2):
        for j2 in range(2):
            col0 = (i2 * 2 + j2) * 32
            for kh in range(2):
                for kw in range(2):
                    row0 = ((i2 + kh) * 3 + (j2 + kw)) * 16
                    W2b[row0:row0 + 16, col0:col0 + 32] = w2[kh, kw]

    # Conv3 covers the full 2x2 extent: exact im2col weight, padded to 128 cols.
    W3p = np.zeros((128, 128), np.float32)
    W3p[:, :64] = w3.reshape(4 * 32, 64)

    # Actor head padded to 128x128 (zero pad rows/cols keep pad lanes exactly 0:
    # relu(0)=0, tanh(0)=0, zero weight rows contribute nothing).
    Wa1p = np.zeros((128, 128), np.float32)
    Wa1p[:64, :64] = wa1
    Wa2p = np.zeros((128, 128), np.float32)
    Wa2p[:64, :A] = wa2

    Wtail = np.concatenate([W2b, W3p, Wa1p, Wa2p], axis=0)       # (640, 128)

    Btail = np.zeros((4, 128), np.float32)
    Btail[0, :] = np.tile(b2.reshape(-1), 4)
    Btail[1, :64] = b3.reshape(-1)
    Btail[2, :64] = ba1.reshape(-1)
    Btail[3, :A] = ba2.reshape(-1)

    return (jnp.asarray(W1b, jnp.bfloat16),
            jnp.asarray(b1b, jnp.float32),
            jnp.asarray(Wtail, jnp.bfloat16),
            jnp.asarray(Btail, jnp.float32))


# ---------------------------------------------------------------------------
# Pure-JAX f32 reference matching the PyTorch forward.
# ---------------------------------------------------------------------------
def ref_forward(x, params):
    w1, b1, w2, b2, w3, b3, wa1, ba1, wa2, ba2 = params

    def conv(y, w, b):
        o = jax.lax.conv_general_dilated(
            y, w, window_strides=(1, 1), padding='VALID',
            dimension_numbers=('NHWC', 'HWIO', 'NHWC'))
        return o + b.reshape(1, 1, 1, -1)

    y = jax.nn.relu(conv(x, w1, b1))
    y = jax.lax.reduce_window(y, -jnp.inf, jax.lax.max,
                              (1, 2, 2, 1), (1, 2, 2, 1), 'VALID')
    y = jax.nn.relu(conv(y, w2, b2))
    y = jax.nn.relu(conv(y, w3, b3))
    y = y.reshape(y.shape[0], -1)
    h = jnp.tanh(y @ wa1 + ba1)
    return h @ wa2 + ba2


def init_params(key):
    ks = jax.random.split(key, 10)

    def u(k, shape, fan_in):
        bound = 1.0 / np.sqrt(fan_in)
        return jax.random.uniform(k, shape, jnp.float32, -bound, bound)

    w1 = u(ks[0], (2, 2, 3, 16), 2 * 2 * 3)
    b1 = u(ks[1], (1, 16), 2 * 2 * 3)
    w2 = u(ks[2], (2, 2, 16, 32), 2 * 2 * 16)
    b2 = u(ks[3], (1, 32), 2 * 2 * 16)
    w3 = u(ks[4], (2, 2, 32, 64), 2 * 2 * 32)
    b3 = u(ks[5], (1, 64), 2 * 2 * 32)
    wa1 = u(ks[6], (64, 64), 64)
    ba1 = u(ks[7], (1, 64), 64)
    wa2 = u(ks[8], (64, A), 64)
    ba2 = u(ks[9], (1, A), 64)
    return (w1, b1, w2, b2, w3, b3, wa1, ba1, wa2, ba2)


if __name__ == "__main__":
    key = jax.random.PRNGKey(0)
    kx, kp = jax.random.split(key)
    B = 2
    # MiniGrid image observation batch, NHWC = (B, 7, 7, 3)
    x = jax.random.uniform(kx, (B, H, W, C_IN), jnp.float32)
    params = init_params(kp)
    prepared = prepare_params(params)

    out = policy_forward(x, prepared)
    out = jax.block_until_ready(out)
    assert out.shape == (B, A)

    ref = ref_forward(x, params)
    # bf16 matmuls (f32 accumulation) -> looser tolerance than pure f32.
    np.testing.assert_allclose(np.asarray(out), np.asarray(ref),
                               rtol=3e-2, atol=3e-2)
    print("KERNEL_OK")
</pallas_src>

<mosaic_0001>
module attributes {stable_mosaic.version = 11 : i64} {
  func.func @policy_kernel(%arg0: i32, %arg1: memref<16x147xbf16, #tpu.memory_space<vmem>>, %arg2: memref<147x1024xbf16, #tpu.memory_space<vmem>>, %arg3: memref<1x1024xf32, #tpu.memory_space<vmem>>, %arg4: memref<640x128xbf16, #tpu.memory_space<vmem>>, %arg5: memref<4x128xf32, #tpu.memory_space<vmem>>, %arg6: memref<16x128xf32, #tpu.memory_space<vmem>>) attributes {dimension_semantics = [#tpu.dimension_semantics<parallel>], iteration_bounds = array<i64: 1>, scalar_prefetch = 0 : i64, scratch_operands = 0 : i64, tpu.core_type = #tpu.core_type<tc>, window_params = [{transform_indices = @transform_0, window_bounds = array<i64: 16, 147>}, {pipeline_mode = #tpu.pipeline_mode<synchronous>, transform_indices = @transform_1, window_bounds = array<i64: 147, 1024>}, {pipeline_mode = #tpu.pipeline_mode<synchronous>, transform_indices = @transform_2, window_bounds = array<i64: 1, 1024>}, {pipeline_mode = #tpu.pipeline_mode<synchronous>, transform_indices = @transform_3, window_bounds = array<i64: 640, 128>}, {pipeline_mode = #tpu.pipeline_mode<synchronous>, transform_indices = @transform_4, window_bounds = array<i64: 4, 128>}, {transform_indices = @transform_5, window_bounds = array<i64: 16, 128>}]} {
    %c0 = arith.constant 0 : index
    %c0_0 = arith.constant 0 : index
    %0 = vector.load %arg1[%c0, %c0_0] : memref<16x147xbf16, #tpu.memory_space<vmem>>, vector<16x147xbf16>
    %c0_1 = arith.constant 0 : index
    %c0_2 = arith.constant 0 : index
    %1 = vector.load %arg5[%c0_1, %c0_2] : memref<4x128xf32, #tpu.memory_space<vmem>>, vector<4x128xf32>
    %c0_3 = arith.constant 0 : index
    %c0_4 = arith.constant 0 : index
    %2 = vector.load %arg2[%c0_3, %c0_4] : memref<147x1024xbf16, #tpu.memory_space<vmem>>, vector<147x1024xbf16>
    %cst = arith.constant dense<0.000000e+00> : vector<16x1024xf32>
    %3 = tpu.matmul %0, %2, %cst {dimension_numbers = #tpu.dot_dimension_numbers<[1], [0], [0], [1], [0, 0, 1, 1], [], []>} : vector<16x147xbf16>, vector<147x1024xbf16>, vector<16x1024xf32> -> vector<16x1024xf32>
    %c0_5 = arith.constant 0 : index
    %c0_6 = arith.constant 0 : index
    %4 = vector.load %arg3[%c0_5, %c0_6] : memref<1x1024xf32, #tpu.memory_space<vmem>>, vector<1x1024xf32>
    %5 = vector.broadcast %4 : vector<1x1024xf32> to vector<16x1024xf32>
    %6 = arith.addf %3, %5 : vector<16x1024xf32>
    %cst_7 = arith.constant 0.000000e+00 : f32
    %7 = vector.broadcast %cst_7 : f32 to vector<16x1024xf32>
    %8 = arith.maximumf %6, %7 : vector<16x1024xf32>
    %9 = vector.extract_strided_slice %8 {offsets = [0, 0], sizes = [16, 256], strides = [1, 1]} : vector<16x1024xf32> to vector<16x256xf32>
    %10 = vector.extract_strided_slice %8 {offsets = [0, 256], sizes = [16, 256], strides = [1, 1]} : vector<16x1024xf32> to vector<16x256xf32>
    %11 = arith.maximumf %9, %10 : vector<16x256xf32>
    %12 = vector.extract_strided_slice %8 {offsets = [0, 512], sizes = [16, 256], strides = [1, 1]} : vector<16x1024xf32> to vector<16x256xf32>
    %13 = vector.extract_strided_slice %8 {offsets = [0, 768], sizes = [16, 256], strides = [1, 1]} : vector<16x1024xf32> to vector<16x256xf32>
    %14 = arith.maximumf %12, %13 : vector<16x256xf32>
    %15 = arith.maximumf %11, %14 : vector<16x256xf32>
    %16 = arith.truncf %15 : vector<16x256xf32> to vector<16x256xbf16>
    %c0_8 = arith.constant 0 : index
    %c0_9 = arith.constant 0 : index
    %17 = vector.load %arg4[%c0_8, %c0_9] : memref<640x128xbf16, #tpu.memory_space<vmem>>, vector<256x128xbf16>
    %cst_10 = arith.constant dense<0.000000e+00> : vector<16x128xf32>
    %18 = tpu.matmul %16, %17, %cst_10 {dimension_numbers = #tpu.dot_dimension_numbers<[1], [0], [0], [1], [0, 0, 1, 1], [], []>} : vector<16x256xbf16>, vector<256x128xbf16>, vector<16x128xf32> -> vector<16x128xf32>
    %19 = vector.extract_strided_slice %1 {offsets = [0, 0], sizes = [1, 128], strides = [1, 1]} : vector<4x128xf32> to vector<1x128xf32>
    %20 = vector.broadcast %19 : vector<1x128xf32> to vector<16x128xf32>
    %21 = arith.addf %18, %20 : vector<16x128xf32>
    %cst_11 = arith.constant 0.000000e+00 : f32
    %22 = vector.broadcast %cst_11 : f32 to vector<16x128xf32>
    %23 = arith.maximumf %21, %22 : vector<16x128xf32>
    %24 = arith.truncf %23 : vector<16x128xf32> to vector<16x128xbf16>
    %c256 = arith.constant 256 : index
    %c0_12 = arith.constant 0 : index
    %25 = vector.load %arg4[%c256, %c0_12] : memref<640x128xbf16, #tpu.memory_space<vmem>>, vector<128x128xbf16>
    %cst_13 = arith.constant dense<0.000000e+00> : vector<16x128xf32>
    %26 = tpu.matmul %24, %25, %cst_13 {dimension_numbers = #tpu.dot_dimension_numbers<[1], [0], [0], [1], [0, 0, 1, 1], [], []>} : vector<16x128xbf16>, vector<128x128xbf16>, vector<16x128xf32> -> vector<16x128xf32>
    %27 = vector.extract_strided_slice %1 {offsets = [1, 0], sizes = [1, 128], strides = [1, 1]} : vector<4x128xf32> to vector<1x128xf32>
    %28 = vector.broadcast %27 : vector<1x128xf32> to vector<16x128xf32>
    %29 = arith.addf %26, %28 : vector<16x128xf32>
    %cst_14 = arith.constant 0.000000e+00 : f32
    %30 = vector.broadcast %cst_14 : f32 to vector<16x128xf32>
    %31 = arith.maximumf %29, %30 : vector<16x128xf32>
    %32 = arith.truncf %31 : vector<16x128xf32> to vector<16x128xbf16>
    %c384 = arith.constant 384 : index
    %c0_15 = arith.constant 0 : index
    %33 = vector.load %arg4[%c384, %c0_15] : memref<640x128xbf16, #tpu.memory_space<vmem>>, vector<128x128xbf16>
    %cst_16 = arith.constant dense<0.000000e+00> : vector<16x128xf32>
    %34 = tpu.matmul %32, %33, %cst_16 {dimension_numbers = #tpu.dot_dimension_numbers<[1], [0], [0], [1], [0, 0, 1, 1], [], []>} : vector<16x128xbf16>, vector<128x128xbf16>, vector<16x128xf32> -> vector<16x128xf32>
    %35 = vector.extract_strided_slice %1 {offsets = [2, 0], sizes = [1, 128], strides = [1, 1]} : vector<4x128xf32> to vector<1x128xf32>
    %36 = vector.broadcast %35 : vector<1x128xf32> to vector<16x128xf32>
    %37 = arith.addf %34, %36 : vector<16x128xf32>
    %38 = math.tanh %37 : vector<16x128xf32>
    %39 = arith.truncf %38 : vector<16x128xf32> to vector<16x128xbf16>
    %c512 = arith.constant 512 : index
    %c0_17 = arith.constant 0 : index
    %40 = vector.load %arg4[%c512, %c0_17] : memref<640x128xbf16, #tpu.memory_space<vmem>>, vector<128x128xbf16>
    %cst_18 = arith.constant dense<0.000000e+00> : vector<16x128xf32>
    %41 = tpu.matmul %39, %40, %cst_18 {dimension_numbers = #tpu.dot_dimension_numbers<[1], [0], [0], [1], [0, 0, 1, 1], [], []>} : vector<16x128xbf16>, vector<128x128xbf16>, vector<16x128xf32> -> vector<16x128xf32>
    %42 = vector.extract_strided_slice %1 {offsets = [3, 0], sizes = [1, 128], strides = [1, 1]} : vector<4x128xf32> to vector<1x128xf32>
    %43 = vector.broadcast %42 : vector<1x128xf32> to vector<16x128xf32>
    %44 = arith.addf %41, %43 : vector<16x128xf32>
    %c0_19 = arith.constant 0 : index
    %c0_20 = arith.constant 0 : index
    %45 = vector.load %arg6[%c0_19, %c0_20] : memref<16x128xf32, #tpu.memory_space<vmem>>, vector<16x128xf32>
    tpu.vector_store %arg6[%c0_19, %c0_20], %44 {strides = array<i32>} : memref<16x128xf32, #tpu.memory_space<vmem>>, vector<16x128xf32>,
    return
  }
  func.func @transform_0(%arg0: i32) -> (i32, i32) {
    %c0_i32 = arith.constant 0 : i32
    %c0_i32_0 = arith.constant 0 : i32
    return %arg0, %c0_i32 : i32, i32
  }
  func.func @transform_1(%arg0: i32) -> (i32, i32) {
    %c0_i32 = arith.constant 0 : i32
    %c0_i32_0 = arith.constant 0 : i32
    %c0_i32_1 = arith.constant 0 : i32
    return %c0_i32, %c0_i32_0 : i32, i32
  }
  func.func @transform_2(%arg0: i32) -> (i32, i32) {
    %c0_i32 = arith.constant 0 : i32
    %c0_i32_0 = arith.constant 0 : i32
    %c0_i32_1 = arith.constant 0 : i32
    return %c0_i32, %c0_i32_0 : i32, i32
  }
  func.func @transform_3(%arg0: i32) -> (i32, i32) {
    %c0_i32 = arith.constant 0 : i32
    %c0_i32_0 = arith.constant 0 : i32
    %c0_i32_1 = arith.constant 0 : i32
    return %c0_i32, %c0_i32_0 : i32, i32
  }
  func.func @transform_4(%arg0: i32) -> (i32, i32) {
    %c0_i32 = arith.constant 0 : i32
    %c0_i32_0 = arith.constant 0 : i32
    %c0_i32_1 = arith.constant 0 : i32
    return %c0_i32, %c0_i32_0 : i32, i32
  }
  func.func @transform_5(%arg0: i32) -> (i32, i32) {
    %c0_i32 = arith.constant 0 : i32
    %c0_i32_0 = arith.constant 0 : i32
    return %arg0, %c0_i32 : i32, i32
  }
}

</mosaic_0001>

<bundles_post_ra>
// kernel: tpu_custom_call.1
= control target key start
LH: loop header
LB: loop body
LE: loop exit
PB: predicated region body
PF: predicated region fallthrough
CT: control target
= control target key end

     0   :  { %10 = vsyncpa [#allocation3], 0  ;;  %s1980_s0 = inlined_call_operand.hbm [shape: bf16[16,147], index: 0, kind: input, shape index: {}]   ;;  %s1981_s1 = inlined_call_operand.hbm [shape: bf16[147,1024], index: 1, kind: input, shape index: {}]   ;;  %s1982_s2 = inlined_call_operand.hbm [shape: f32[1,1024], index: 2, kind: input, shape index: {}]   ;;  %s1983_s3 = inlined_call_operand.hbm [shape: bf16[640,128], index: 3, kind: input, shape index: {}]   ;;  %s1984_s4 = inlined_call_operand.vmem [shape: f32[4,128], index: 4, kind: input, shape index: {}]   ;;  %s1985_s5 = inlined_call_operand.hbm [shape: f32[16,128], index: 5, kind: output, shape index: {}]  }
   0x1   :  { %11 = vsyncpa [#allocation6], 0 }
   0x2   :  { %12 = vsyncpa [#allocation9], 0 }
   0x3   :  { %13 = vsyncpa [#allocation4], 0  ;;  %s1771_s18 = smov [#allocation5]   ;;  %s1653_s22 = scalar_lea.hbm %s1981_s1, 9728 }
   0x4   :  { %s31_s19 = sshll.u32 %s1771_s18, 4  ;;  %p1654_p0 = scmp.ne.s32.totalorder %s1981_s1, %s1653_s22  ;;  %s32_s19 = int_to_ptr.vmem [resolvable:$true] %s31_s19 }
   0x5   :  { %p1657_p1 = scmp.lt.u32.totalorder %s1653_s22, %s1981_s1 }
   0x7   :  { %p1659_p2 = pnand %p1657_p1, %p1654_p0 }
   0x9   :  { %1662 = shalt.err (!%p1659_p2)
}
   0xa   :  { %s1663_s27 = scalar_lea.vmem %s32_s19, 9728  ;;  %p1668_p4 = scmp.lt.s32.totalorder %s32_s19, %s32_s19 }
   0xb   :  { %p1664_p3 = scmp.ne.s32.totalorder %s32_s19, %s1663_s27  ;;  %p1669_p5 = scmp.lt.s32.totalorder %s1663_s27, %s1663_s27 }
   0xd   :  { %p1670_p6 = por %p1669_p5, %p1668_p4 }
   0xf   :  { %p1671_p7 = pnand %p1670_p6, %p1664_p3 }
  0x11   :  { %1674 = shalt.err (!%p1671_p7)
}
  0x12   :  { %s1772_s28 = smov 512   ;;  %s1773_s29 = smov 32  }
  0x13   :  { %37 = dma.hbm_to_vmem [thread:$0]  %s1981_s1, 9728, %s32_s19, [#allocation6], %s1772_s28, %s1772_s28, %s1773_s29  }
  0x14   :  { %s1774_s7 = smov [#allocation2]   ;;  %s1675_s11 = scalar_lea.hbm %s1980_s0, 256 }
  0x15   :  { %s19_s8 = sshll.u32 %s1774_s7, 4  ;;  %p1676_p8 = scmp.ne.s32.totalorder %s1980_s0, %s1675_s11  ;;  %s20_s8 = int_to_ptr.vmem [resolvable:$true] %s19_s8 }
  0x16   :  { %p1679_p9 = scmp.lt.u32.totalorder %s1675_s11, %s1980_s0 }
  0x18   :  { %p1681_p10 = pnand %p1679_p9, %p1676_p8 }
  0x1a   :  { %1684 = shalt.err (!%p1681_p10)
}
  0x1b   :  { %s1685_s16 = scalar_lea.vmem %s20_s8, 256  ;;  %p1690_p12 = scmp.lt.s32.totalorder %s20_s8, %s20_s8 }
  0x1c   :  { %p1686_p11 = scmp.ne.s32.totalorder %s20_s8, %s1685_s16  ;;  %p1691_p13 = scmp.lt.s32.totalorder %s1685_s16, %s1685_s16 }
  0x1e   :  { %p1692_p0 = por %p1691_p13, %p1690_p12 }
  0x20   :  { %p1693_p1 = pnand %p1692_p0, %p1686_p11 }
  0x22   :  { %1696 = shalt.err (!%p1693_p1)
}
  0x23   :  { %s1775_s1 = smov 128   ;;  %s1776_s17 = smov 8  }
  0x24   :  { %25 = dma.hbm_to_vmem [thread:$0]  %s1980_s0, 256, %s20_s8, [#allocation3], %s1775_s1, %s1775_s1, %s1776_s17  }
  0x25   :  { %s1777_s20 = smov [#allocation7]   ;;  %s1778_s22 = smov [#allocation8]  }
  0x26   :  { %s44_s21 = sshll.u32 %s1777_s20, 4  ;;  %s53_s23 = sshll.u32 %s1778_s22, 4  ;;  %s45_s21 = int_to_ptr.vmem [resolvable:$true] %s44_s21  ;;  %s1842_s23 = int_to_ptr.vmem [resolvable:$true] %s53_s23 }
  0x27   :  { %s1697_s26 = scalar_lea.hbm %s1982_s2, 128 }
  0x28   :  { %p1698_p2 = scmp.ne.s32.totalorder %s1982_s2, %s1697_s26  ;;  %p1701_p3 = scmp.lt.u32.totalorder %s1697_s26, %s1982_s2 }
  0x2a   :  { %p1703_p4 = pnand %p1701_p3, %p1698_p2 }
  0x2c   :  { %1706 = shalt.err (!%p1703_p4)
}
  0x2d   :  { %s1707_s0 = scalar_lea.vmem %s45_s21, 128  ;;  %p1712_p6 = scmp.lt.s32.totalorder %s45_s21, %s45_s21 }
  0x2e   :  { %p1708_p5 = scmp.ne.s32.totalorder %s45_s21, %s1707_s0  ;;  %p1713_p7 = scmp.lt.s32.totalorder %s1707_s0, %s1707_s0 }
  0x30   :  { %p1714_p8 = por %p1713_p7, %p1712_p6 }
  0x32   :  { %p1715_p9 = pnand %p1714_p8, %p1708_p5 }
  0x34   :  { %1718 = shalt.err (!%p1715_p9)
}
  0x35   :  { %47 = dma.hbm_to_vmem [thread:$0]  %s1982_s2, 128, %s45_s21, [#allocation6]  }
  0x36   :  { %s1719_s10 = scalar_lea.hbm %s1983_s3, 5120 }
  0x37   :  { %p1720_p10 = scmp.ne.s32.totalorder %s1983_s3, %s1719_s10  ;;  %p1723_p11 = scmp.lt.u32.totalorder %s1719_s10, %s1983_s3 }
  0x39   :  { %p1725_p12 = pnand %p1723_p11, %p1720_p10 }
  0x3b   :  { %1728 = shalt.err (!%p1725_p12)
}
  0x3c   :  { %s1729_s15 = scalar_lea.vmem %s1842_s23, 5120  ;;  %p1734_p0 = scmp.lt.s32.totalorder %s1842_s23, %s1842_s23 }
  0x3d   :  { %p1730_p13 = scmp.ne.s32.totalorder %s1842_s23, %s1729_s15  ;;  %p1735_p1 = scmp.lt.s32.totalorder %s1729_s15, %s1729_s15 }
  0x3f   :  { %p1736_p2 = por %p1735_p1, %p1734_p0 }
  0x41   :  { %p1737_p3 = pnand %p1736_p2, %p1730_p13 }
  0x43   :  { %1740 = shalt.err (!%p1737_p3)
}
  0x44   :  { %s1779_s2 = smov 64   ;;  %s1780_s16 = smov 4  }
  0x45   :  { %59 = dma.hbm_to_vmem [thread:$0]  %s1983_s3, 5120, %s1842_s23, [#allocation9], %s1779_s2, %s1779_s2, %s1780_s16  }
  0x46   :  { %1763 = dma.done.wait [#allocation3], 256  }
  0x47   :  { %1764 = vsyncadd [#allocation3], 4294967040 }
  0x48   :  { %1765 = dma.done.wait [#allocation6], 9856  }
  0x49   :  { %1766 = vsyncadd [#allocation6], 4294957440 }
  0x4a   :  { %1767 = dma.done.wait [#allocation9], 5120  }
  0x4b   :  { %1768 = vsyncadd [#allocation9], 4294962176  ;;  %v78_v0 = vld [vmem:[#allocation5] sm:$0xff]  ;;  %v79_v2 = vld [vmem:[#allocation5 + $0x8] sm:$0xff]  ;;  %vm585_vm0 = vcmask 154624   ;;  %vm589_vm1 = vcmask 1040384  }
  0x4c   :  { %v82_v1 = vld [vmem:[#allocation5 + $0x20] sm:$0xff]  ;;  %v83_v4 = vld [vmem:[#allocation5 + $0x28] sm:$0xff]  ;;  %v1873_v37 = vld [vmem:[#allocation2 + $0x4] ss:$8 sps:$4 sm:$0xff]   ;;  %vm590_vm2 = vcmask 1041408   ;;  %v1781_v59 = vmov 65535  }
  0x4d   :  { %v1352_v3 = vcombine.high %v78_v0, %v82_v1  ;;  %v1351_v5 = vcombine.low %v78_v0, %v82_v1  ;;  %v86_v6 = vld [vmem:[#allocation5 + $0x40] sm:$0xff]  ;;  %v1354_v8 = vcombine.high %v79_v2, %v83_v4  ;;  %v1353_v9 = vcombine.low %v79_v2, %v83_v4  ;;  %v87_v11 = vld [vmem:[#allocation5 + $0x48] sm:$0xff]  ;;  %1431 = vmatprep.mubr.msk.bf16.mxu0 %vm585_vm0, %v1873_v37 }
  0x4e   :  { %v90_v7 = vld [vmem:[#allocation5 + $0x60] sm:$0xff]  ;;  %v91_v12 = vld [vmem:[#allocation5 + $0x68] sm:$0xff]  ;;  %1432 = vmatprep.mubr.msk.bf16.mxu1 %vm585_vm0, %v1873_v37  ;;  %v591_v60 = vsel %vm589_vm1, 4294967295, %v1781_v59  ;;  %vm1783_vm3 = vmmov 0  }
  0x4f   :  { %v1360_v10 = vcombine.high %v86_v6, %v90_v7  ;;  %v94_v13 = vld [vmem:[#allocation5 + $0x80] sm:$0xff]  ;;  %617 = vmatprep.subr.bf16.mxu0 %v1352_v3  ;;  %v1362_v14 = vcombine.high %v87_v11, %v91_v12  ;;  %v95_v16 = vld [vmem:[#allocation5 + $0x88] sm:$0xff]  ;;  %660 = vmatprep.subr.bf16.mxu1 %v1354_v8  ;;  %v1359_v18 = vcombine.low %v86_v6, %v90_v7  ;;  %v1880_v6 = vsel %vm590_vm2, %v591_v60, 0 }
  0x50   :  { %v98_v15 = vld [vmem:[#allocation5 + $0xa0] sm:$0xff]  ;;  %v99_v17 = vld [vmem:[#allocation5 + $0xa8] sm:$0xff]  ;;  %618 = vmatpush1.bf16.msra.mxu0 %v1351_v5  ;;  %661 = vmatpush1.bf16.msra.mxu1 %v1353_v9  ;;  %v1361_v19 = vcombine.low %v87_v11, %v91_v12 }
  0x51   :  { %619 = vmatprep.subr.bf16.mxu0 %v1360_v10  ;;  %v1368_v20 = vcombine.high %v94_v13, %v98_v15  ;;  %662 = vmatprep.subr.bf16.mxu1 %v1362_v14  ;;  %v1370_v21 = vcombine.high %v95_v16, %v99_v17  ;;  %v102_v22 = vld [vmem:[#allocation5 + $0xc0] sm:$0xff]  ;;  %v103_v24 = vld [vmem:[#allocation5 + $0xc8] sm:$0xff]  ;;  %v1367_v26 = vcombine.low %v94_v13, %v98_v15 }
  0x52   :  { %v106_v23 = vld [vmem:[#allocation5 + $0xe0] sm:$0xff]  ;;  %v107_v25 = vld [vmem:[#allocation5 + $0xe8] sm:$0xff]  ;;  %v1369_v27 = vcombine.low %v95_v16, %v99_v17  ;;  %v80_v16 = vld [vmem:[#allocation5 + $0x10] sm:$0xff] }
  0x53   :  { %v1376_v28 = vcombine.high %v102_v22, %v106_v23  ;;  %v1378_v29 = vcombine.high %v103_v24, %v107_v25  ;;  %v110_v30 = vld [vmem:[#allocation5 + $0x100] sm:$0xff]  ;;  %v111_v32 = vld [vmem:[#allocation5 + $0x108] sm:$0xff]  ;;  %v1375_v34 = vcombine.low %v102_v22, %v106_v23  ;;  %v1377_v35 = vcombine.low %v103_v24, %v107_v25  ;;  %v84_v17 = vld [vmem:[#allocation5 + $0x30] sm:$0xff] }
  0x54   :  { %620 = vmatpush1.bf16.msra.mxu0 %v1359_v18  ;;  %663 = vmatpush1.bf16.msra.mxu1 %v1361_v19  ;;  %v114_v31 = vld [vmem:[#allocation5 + $0x120] sm:$0xff]  ;;  %v115_v33 = vld [vmem:[#allocation5 + $0x128] sm:$0xff]  ;;  %v85_v22 = vld [vmem:[#allocation5 + $0x38] sm:$0xff] }
  0x55   :  { %621 = vmatprep.subr.bf16.mxu0 %v1368_v20  ;;  %664 = vmatprep.subr.bf16.mxu1 %v1370_v21  ;;  %v1384_v36 = vcombine.high %v110_v30, %v114_v31  ;;  %v1386_v38 = vcombine.high %v111_v32, %v115_v33  ;;  %v118_v39 = vld [vmem:[#allocation5 + $0x140] sm:$0xff]  ;;  %v119_v41 = vld [vmem:[#allocation5 + $0x148] sm:$0xff]  ;;  %v1383_v43 = vcombine.low %v110_v30, %v114_v31  ;;  %v81_v21 = vld [vmem:[#allocation5 + $0x18] sm:$0xff] }
  0x56   :  { %v122_v40 = vld [vmem:[#allocation5 + $0x160] sm:$0xff]  ;;  %v123_v42 = vld [vmem:[#allocation5 + $0x168] sm:$0xff]  ;;  %v1385_v44 = vcombine.low %v111_v32, %v115_v33  ;;  %v88_v25 = vld [vmem:[#allocation5 + $0x50] sm:$0xff]  ;;  %v1358_v32 = vcombine.high %v81_v21, %v85_v22  ;;  %v1355_v33 = vcombine.low %v80_v16, %v84_v17 }
  0x57   :  { %v1392_v45 = vcombine.high %v118_v39, %v122_v40  ;;  %v1394_v46 = vcombine.high %v119_v41, %v123_v42  ;;  %v126_v47 = vld [vmem:[#allocation5 + $0x180] sm:$0xff]  ;;  %v127_v49 = vld [vmem:[#allocation5 + $0x188] sm:$0xff]  ;;  %v1391_v51 = vcombine.low %v118_v39, %v122_v40  ;;  %v1393_v52 = vcombine.low %v119_v41, %v123_v42  ;;  %v89_v30 = vld [vmem:[#allocation5 + $0x58] sm:$0xff] }
  0x58   :  { %622 = vmatpush1.bf16.msra.mxu0 %v1367_v26  ;;  %665 = vmatpush1.bf16.msra.mxu1 %v1369_v27  ;;  %v130_v48 = vld [vmem:[#allocation5 + $0x1a0] sm:$0xff]  ;;  %v131_v50 = vld [vmem:[#allocation5 + $0x1a8] sm:$0xff]  ;;  %v92_v26 = vld [vmem:[#allocation5 + $0x70] sm:$0xff] }
  0x59   :  { %623 = vmatprep.subr.bf16.mxu0 %v1376_v28  ;;  %666 = vmatprep.subr.bf16.mxu1 %v1378_v29  ;;  %v1400_v53 = vcombine.high %v126_v47, %v130_v48  ;;  %v1402_v54 = vcombine.high %v127_v49, %v131_v50  ;;  %v134_v55 = vld [vmem:[#allocation5 + $0x1c0] sm:$0xff]  ;;  %v135_v57 = vld [vmem:[#allocation5 + $0x1c8] sm:$0xff]  ;;  %v1399_v61 = vcombine.low %v126_v47, %v130_v48  ;;  %v1886_v28 = vld [vmem:[#allocation2] ss:$8 sps:$4 sm:$0xff]  }
  0x5a   :  { %v138_v56 = vld [vmem:[#allocation5 + $0x1e0] sm:$0xff]  ;;  %v139_v58 = vld [vmem:[#allocation5 + $0x1e8] sm:$0xff]  ;;  %v1401_v62 = vcombine.low %v127_v49, %v131_v50  ;;  %v1356_v29 = vcombine.high %v80_v16, %v84_v17  ;;  %v93_v31 = vld [vmem:[#allocation5 + $0x78] sm:$0xff]  ;;  %v1363_v42 = vcombine.low %v88_v25, %v92_v26 }
  0x5b   :  { %v1408_v63 = vcombine.high %v134_v55, %v138_v56  ;;  %v142_v0 = vld [vmem:[#allocation5 + $0x200] sm:$0xff]  ;;  %v143_v2 = vld [vmem:[#allocation5 + $0x208] sm:$0xff]  ;;  %v1410_v3 = vcombine.high %v135_v57, %v139_v58  ;;  %v1407_v8 = vcombine.low %v134_v55, %v138_v56  ;;  %v1409_v9 = vcombine.low %v135_v57, %v139_v58  ;;  %v97_v39 = vld [vmem:[#allocation5 + $0x98] sm:$0xff] }
  0x5c   :  { %624 = vmatpush1.bf16.msra.mxu0 %v1375_v34  ;;  %667 = vmatpush1.bf16.msra.mxu1 %v1377_v35  ;;  %v146_v1 = vld [vmem:[#allocation5 + $0x220] sm:$0xff]  ;;  %v147_v4 = vld [vmem:[#allocation5 + $0x228] sm:$0xff]  ;;  %v96_v34 = vld [vmem:[#allocation5 + $0x90] sm:$0xff]  ;;  %v1366_v41 = vcombine.high %v89_v30, %v93_v31 }
  0x5d   :  { %625 = vmatprep.subr.bf16.mxu0 %v1384_v36  ;;  %668 = vmatprep.subr.bf16.mxu1 %v1386_v38  ;;  %v150_v5 = vld [vmem:[#allocation5 + $0x240] sm:$0x33]  ;;  %v151_v7 = vld [vmem:[#allocation5 + $0x248] sm:$0x33]  ;;  %v1416_v10 = vcombine.high %v142_v0, %v146_v1  ;;  %v1418_v12 = vcombine.high %v143_v2, %v147_v4  ;;  %v1415_v14 = vcombine.low %v142_v0, %v146_v1  ;;  %v100_v35 = vld [vmem:[#allocation5 + $0xb0] sm:$0xff] }
  0x5e   :  { %v1424_v11 = vcombine.high %v150_v5, %v150_v5  ;;  %v1426_v13 = vcombine.high %v151_v7, %v151_v7  ;;  %v1423_v15 = vcombine.low %v150_v5, %v150_v5  ;;  %v1417_v18 = vcombine.low %v143_v2, %v147_v4  ;;  %v101_v40 = vld [vmem:[#allocation5 + $0xb8] sm:$0xff]  ;;  %v128_v5 = vld [vmem:[#allocation5 + $0x190] sm:$0xff] }
  0x5f   :  { %v1425_v20 = vcombine.low %v151_v7, %v151_v7  ;;  %v1357_v36 = vcombine.low %v81_v21, %v85_v22  ;;  %v1364_v38 = vcombine.high %v88_v25, %v92_v26  ;;  %v105_v47 = vld [vmem:[#allocation5 + $0xd8] sm:$0xff]  ;;  %v1374_v49 = vcombine.high %v97_v39, %v101_v40  ;;  %v132_v7 = vld [vmem:[#allocation5 + $0x1b0] sm:$0xff] }
  0x60   :  { %626 = vmatpush1.bf16.msra.mxu0 %v1383_v43  ;;  %669 = vmatpush1.bf16.msra.mxu1 %v1385_v44  ;;  %v597_v19 = vand.u32 %v1424_v11, %v1880_v6  ;;  %v603_v23 = vand.u32 %v1426_v13, %v1880_v6  ;;  %v594_v24 = vand.u32 %v1423_v15, %v1880_v6  ;;  %v104_v43 = vld [vmem:[#allocation5 + $0xd0] sm:$0xff]  ;;  %v109_v48 = vld [vmem:[#allocation5 + $0xf8] sm:$0xff] }
  0x61   :  { %627 = vmatprep.subr.bf16.mxu0 %v1392_v45  ;;  %670 = vmatprep.subr.bf16.mxu1 %v1394_v46  ;;  %v600_v27 = vand.u32 %v1425_v20, %v1880_v6  ;;  %v108_v44 = vld [vmem:[#allocation5 + $0xf0] sm:$0xff]  ;;  %v1365_v45 = vcombine.low %v89_v30, %v93_v31  ;;  %v1372_v46 = vcombine.high %v96_v34, %v100_v35  ;;  %v113_v55 = vld [vmem:[#allocation5 + $0x118] sm:$0xff] }
  0x62   :  { %v1371_v50 = vcombine.low %v96_v34, %v100_v35  ;;  %v117_v56 = vld [vmem:[#allocation5 + $0x138] sm:$0xff]  ;;  %v1382_v57 = vcombine.high %v105_v47, %v109_v48  ;;  %v1379_v58 = vcombine.low %v104_v43, %v108_v44  ;;  %v1381_v59 = vcombine.low %v105_v47, %v109_v48  ;;  %v140_v15 = vld [vmem:[#allocation5 + $0x1f0] sm:$0xff] }
  0x63   :  { %v125_v0 = vld [vmem:[#allocation5 + $0x178] sm:$0xff]  ;;  %v1389_v2 = vcombine.low %v113_v55, %v117_v56  ;;  %v144_v22 = vld [vmem:[#allocation5 + $0x210] sm:$0xff] }
  0x64   :  { %628 = vmatpush1.bf16.msra.mxu0 %v1391_v51  ;;  %671 = vmatpush1.bf16.msra.mxu1 %v1393_v52  ;;  %v112_v51 = vld [vmem:[#allocation5 + $0x110] sm:$0xff]  ;;  %v137_v16 = vld [vmem:[#allocation5 + $0x1d8] sm:$0xff] }
  0x65   :  { %629 = vmatprep.subr.bf16.mxu0 %v1400_v53  ;;  %672 = vmatprep.subr.bf16.mxu1 %v1402_v54  ;;  %v116_v52 = vld [vmem:[#allocation5 + $0x130] sm:$0xff]  ;;  %v1373_v53 = vcombine.low %v97_v39, %v101_v40  ;;  %v1380_v54 = vcombine.high %v104_v43, %v108_v44  ;;  %v141_v17 = vld [vmem:[#allocation5 + $0x1f8] sm:$0xff]  ;;  %v1609_v44 = vld [vmem:[#allocation8 + $0x40] sm:$0xff]  }
  0x66   :  { %v1388_v60 = vcombine.high %v112_v51, %v116_v52  ;;  %v1387_v1 = vcombine.low %v112_v51, %v116_v52  ;;  %v1414_v21 = vcombine.high %v137_v16, %v141_v17  ;;  %v145_v25 = vld [vmem:[#allocation5 + $0x218] sm:$0xff]  ;;  %v1413_v30 = vcombine.low %v137_v16, %v141_v17  ;;  %v1612_v47 = vld [vmem:[#allocation8 + $0x8] sm:$0xff]   ;;  %v1617_v51 = vld [vmem:[#allocation8 + $0x60] sm:$0xff]  }
  0x67   :  { %v149_v26 = vld [vmem:[#allocation5 + $0x238] sm:$0xff]  ;;  %v1618_v52 = vld [vmem:[#allocation8 + $0x20] sm:$0xff]  }
  0x68   :  { %630 = vmatpush1.bf16.msra.mxu0 %v1399_v61  ;;  %673 = vmatpush1.bf16.msra.mxu1 %v1401_v62  ;;  %v120_v61 = vld [vmem:[#allocation5 + $0x150] sm:$0xff]  ;;  %v1613_v48 = vld [vmem:[#allocation8 + $0x50] sm:$0xff]  }
  0x69   :  { %631 = vmatprep.subr.bf16.mxu0 %v1408_v63  ;;  %674 = vmatprep.subr.bf16.mxu1 %v1410_v3  ;;  %v124_v62 = vld [vmem:[#allocation5 + $0x170] sm:$0xff]  ;;  %v121_v63 = vld [vmem:[#allocation5 + $0x158] sm:$0xff] }
  0x6a   :  { %v1396_v3 = vcombine.high %v120_v61, %v124_v62  ;;  %v1398_v4 = vcombine.high %v121_v63, %v125_v0  ;;  %v1397_v11 = vcombine.low %v121_v63, %v125_v0  ;;  %v156_v63 = vlaneseq }
  0x6c   :  { %632 = vmatpush1.bf16.msra.mxu0 %v1407_v8  ;;  %675 = vmatpush1.bf16.msra.mxu1 %v1409_v9  ;;  %v129_v8 = vld [vmem:[#allocation5 + $0x198] sm:$0xff]  ;;  %v1907_v0 = vshrl.u32 %v156_v63, 7 }
  0x6d   :  { %633 = vmatprep.subr.bf16.mxu0 %v1416_v10  ;;  %676 = vmatprep.subr.bf16.mxu1 %v1418_v12  ;;  %v133_v9 = vld [vmem:[#allocation5 + $0x1b8] sm:$0xff]  ;;  %v1395_v10 = vcombine.low %v120_v61, %v124_v62  ;;  %v1404_v12 = vcombine.high %v128_v5, %v132_v7  ;;  %v1628_v61 = vld [vmem:[#allocation8 + $0x98] sm:$0xff]   ;;  %v1629_v62 = vld [vmem:[#allocation8 + $0xa0] sm:$0xff]  }
  0x6e   :  { %v1406_v13 = vcombine.high %v129_v8, %v133_v9 }
  0x70   :  { %634 = vmatpush1.bf16.msra.mxu0 %v1415_v14  ;;  %677 = vmatpush1.bf16.msra.mxu1 %v1417_v18  ;;  %v136_v14 = vld [vmem:[#allocation5 + $0x1d0] sm:$0xff]  ;;  %v1403_v18 = vcombine.low %v128_v5, %v132_v7  ;;  %v170_v5 = vsub.s32 3, %v1907_v0 }
  0x71   :  { %635 = vmatprep.subr.bf16.mxu0 %v597_v19  ;;  %678 = vmatprep.subr.bf16.mxu1 %v603_v23  ;;  %v1405_v19 = vcombine.low %v129_v8, %v133_v9  ;;  %v1412_v20 = vcombine.high %v136_v14, %v140_v15  ;;  %v148_v23 = vld [vmem:[#allocation5 + $0x230] sm:$0xff] }
  0x72   :  { %v1420_v31 = vcombine.high %v144_v22, %v148_v23  ;;  %v1419_v35 = vcombine.low %v144_v22, %v148_v23 }
  0x74   :  { %636 = vmatpush1.bf16.msra.mxu0 %v594_v24  ;;  %679 = vmatpush1.bf16.msra.mxu1 %v600_v27  ;;  %v152_v24 = vld [vmem:[#allocation5 + $0x250] sm:$0x33]  ;;  %v153_v27 = vld [vmem:[#allocation5 + $0x258] sm:$0x33] }
  0x75   :  { %703 = vmatprep.subr.bf16.mxu0 %v1356_v29  ;;  %746 = vmatprep.subr.bf16.mxu1 %v1358_v32  ;;  %v1411_v29 = vcombine.low %v136_v14, %v140_v15  ;;  %v1428_v32 = vcombine.high %v152_v24, %v152_v24  ;;  %v1430_v34 = vcombine.high %v153_v27, %v153_v27 }
  0x76   :  { %v1429_v40 = vcombine.low %v153_v27, %v153_v27 }
  0x77   :  { %650 = vmatmul.mubr.bf16.vlgmr.msra.gmra.mrb[0].mxu0 %v1886_v28  ;;  %693 = vmatmul.mubr.bf16.vlgmr.msra.gmra.mrb[0].mxu1 %v1886_v28  ;;  %v609_v39 = vand.u32 %v1428_v32, %v1880_v6 }
  0x78   :  { %704 = vmatpush1.bf16.msra.mxu0 %v1355_v33  ;;  %747 = vmatpush1.bf16.msra.mxu1 %v1357_v36  ;;  %v1422_v33 = vcombine.high %v145_v25, %v149_v26  ;;  %v1427_v36 = vcombine.low %v152_v24, %v152_v24  ;;  %v612_v43 = vand.u32 %v1429_v40, %v1880_v6 }
  0x79   :  { %705 = vmatprep.subr.bf16.mxu0 %v1364_v38  ;;  %748 = vmatprep.subr.bf16.mxu1 %v1366_v41  ;;  %v1421_v38 = vcombine.low %v145_v25, %v149_v26  ;;  %v615_v41 = vand.u32 %v1430_v34, %v1880_v6 }
  0x7a   :  { %1433 = vmatprep.mubr.msk.bf16.mxu0 %vm585_vm0, %v1873_v37  ;;  %1434 = vmatprep.mubr.msk.bf16.mxu1 %vm585_vm0, %v1873_v37  ;;  %v1390_v37 = vcombine.high %v113_v55, %v117_v56  ;;  %v1622_v55 = vld [vmem:[#allocation8 + $0x30] sm:$0xff]   ;;  %v1623_v56 = vld [vmem:[#allocation8 + $0x78] sm:$0xff]  }
  0x7c   :  { %706 = vmatpush1.bf16.msra.mxu0 %v1363_v42  ;;  %749 = vmatpush1.bf16.msra.mxu1 %v1365_v45  ;;  %v606_v42 = vand.u32 %v1427_v36, %v1880_v6  ;;  %v1610_v45 = vld [vmem:[#allocation8] sm:$0xff]   ;;  %v1616_v6 = vld [vmem:[#allocation8 + $0x18] sm:$0xff]  }
  0x7d   :  { %707 = vmatprep.subr.bf16.mxu0 %v1372_v46  ;;  %750 = vmatprep.subr.bf16.mxu1 %v1374_v49  ;;  %v1611_v46 = vld [vmem:[#allocation8 + $0x48] sm:$0xff]   ;;  %v1614_v49 = vld [vmem:[#allocation8 + $0x10] sm:$0xff]  }
  0x80   :  { %708 = vmatpush1.bf16.msra.mxu0 %v1371_v50  ;;  %751 = vmatpush1.bf16.msra.mxu1 %v1373_v53  ;;  %v1615_v50 = vld [vmem:[#allocation8 + $0x58] sm:$0xff]   ;;  %v1620_v53 = vld [vmem:[#allocation8 + $0x28] sm:$0xff]  }
  0x81   :  { %709 = vmatprep.subr.bf16.mxu0 %v1380_v54  ;;  %752 = vmatprep.subr.bf16.mxu1 %v1382_v57  ;;  %v1621_v54 = vld [vmem:[#allocation8 + $0x70] sm:$0xff]   ;;  %v1624_v57 = vld [vmem:[#allocation8 + $0x38] sm:$0xff]  }
  0x84   :  { %710 = vmatpush1.bf16.msra.mxu0 %v1379_v58  ;;  %753 = vmatpush1.bf16.msra.mxu1 %v1381_v59  ;;  %v1625_v58 = vld [vmem:[#allocation8 + $0x80] sm:$0xff]   ;;  %v1782_v59 = vmov 0.0  }
  0x85   :  { %711 = vmatprep.subr.bf16.mxu0 %v1388_v60  ;;  %754 = vmatprep.subr.bf16.mxu1 %v1390_v37  ;;  %v1626_v60 = vld [vmem:[#allocation8 + $0x88] sm:$0xff]   ;;  %v1627_v37 = vld [vmem:[#allocation8 + $0x90] sm:$0xff]  }
  0x88   :  { %712 = vmatpush1.bf16.msra.mxu0 %v1387_v1  ;;  %755 = vmatpush1.bf16.msra.mxu1 %v1389_v2  ;;  %v158_v1 = vsub.s32 0, %v1907_v0  ;;  %v154_v2 = vld [vmem:[#allocation7] sm:$0xff] }
  0x89   :  { %713 = vmatprep.subr.bf16.mxu0 %v1396_v3  ;;  %756 = vmatprep.subr.bf16.mxu1 %v1398_v4  ;;  %v166_v3 = vsub.s32 2, %v1907_v0  ;;  %v162_v4 = vsub.s32 1, %v1907_v0 }
  0x8a   :  { %v159_v7 = vrot.slane %v154_v2, %v158_v1 }
  0x8b   :  { %v167_v8 = vrot.slane %v154_v2, %v166_v3  ;;  %v163_v9 = vrot.slane %v154_v2, %v162_v4 }
  0x8c   :  { %714 = vmatpush1.bf16.msra.mxu0 %v1395_v10  ;;  %757 = vmatpush1.bf16.msra.mxu1 %v1397_v11  ;;  %v171_v10 = vrot.slane %v154_v2, %v170_v5 }
  0x8d   :  { %715 = vmatprep.subr.bf16.mxu0 %v1404_v12  ;;  %758 = vmatprep.subr.bf16.mxu1 %v1406_v13 }
  0x90   :  { %716 = vmatpush1.bf16.msra.mxu0 %v1403_v18  ;;  %759 = vmatpush1.bf16.msra.mxu1 %v1405_v19 }
  0x91   :  { %717 = vmatprep.subr.bf16.mxu0 %v1412_v20  ;;  %760 = vmatprep.subr.bf16.mxu1 %v1414_v21 }
  0x94   :  { %718 = vmatpush1.bf16.msra.mxu0 %v1411_v29  ;;  %761 = vmatpush1.bf16.msra.mxu1 %v1413_v30 }
  0x95   :  { %719 = vmatprep.subr.bf16.mxu0 %v1420_v31  ;;  %762 = vmatprep.subr.bf16.mxu1 %v1422_v33 }
  0x98   :  { %720 = vmatpush1.bf16.msra.mxu0 %v1419_v35  ;;  %763 = vmatpush1.bf16.msra.mxu1 %v1421_v38 }
  0x99   :  { %721 = vmatprep.subr.bf16.mxu0 %v609_v39  ;;  %764 = vmatprep.subr.bf16.mxu1 %v615_v41  ;;  %v174_v41 = vsub.s32 4, %v1907_v0 }
  0x9c   :  { %722 = vmatpush1.bf16.msra.mxu0 %v606_v42  ;;  %765 = vmatpush1.bf16.msra.mxu1 %v612_v43  ;;  %v182_v42 = vsub.s32 6, %v1907_v0  ;;  %v178_v43 = vsub.s32 5, %v1907_v0 }
  0x9d   :  { %1475 = vmatprep.subr.bf16.mxu0 %v1609_v44  ;;  %1524 = vmatprep.subr.bf16.mxu1 %v1782_v59  ;;  %v186_v44 = vsub.s32 7, %v1907_v0 }
  0x9f   :  { %736 = vmatmul.mubr.bf16.vlgmr.msra.gmra.mrb[4].mxu0 %v1886_v28  ;;  %779 = vmatmul.mubr.bf16.vlgmr.msra.gmra.mrb[4].mxu1 %v1886_v28  ;;  %v1619_v28 = vld [vmem:[#allocation8 + $0x68] sm:$0xff]  }
  0xa0   :  { %1476 = vmatpush3.bf16.msra.mxu0 %v1610_v45  ;;  %1525 = vmatpush3.bf16.msra.mxu1 %v1625_v58  ;;  %v175_v45 = vrot.slane %v154_v2, %v174_v41 }
  0xa1   :  { %1477 = vmatprep.subr.bf16.mxu0 %v1611_v46  ;;  %1526 = vmatprep.subr.bf16.mxu1 %v1782_v59  ;;  %v183_v46 = vrot.slane %v154_v2, %v182_v42 }
  0xa2   :  { %1540 = vmatprep.mubr.msk.bf16.mxu1 %vm1783_vm3, %v1782_v59 }
  0xa4   :  { %1478 = vmatpush3.bf16.msra.mxu0 %v1612_v47  ;;  %1527 = vmatpush3.bf16.msra.mxu1 %v1626_v60  ;;  %v179_v47 = vrot.slane %v154_v2, %v178_v43 }
  0xa5   :  { %1479 = vmatprep.subr.bf16.mxu0 %v1613_v48  ;;  %1528 = vmatprep.subr.bf16.mxu1 %v1782_v59  ;;  %v187_v48 = vrot.slane %v154_v2, %v186_v44 }
  0xa8   :  { %1480 = vmatpush3.bf16.msra.mxu0 %v1614_v49  ;;  %1529 = vmatpush3.bf16.msra.mxu1 %v1627_v37 }
  0xa9   :  { %1481 = vmatprep.subr.bf16.mxu0 %v1615_v50  ;;  %1530 = vmatprep.subr.bf16.mxu1 %v1782_v59 }
  0xac   :  { %1482 = vmatpush3.bf16.msra.mxu0 %v1616_v6  ;;  %1531 = vmatpush3.bf16.msra.mxu1 %v1628_v61 }
  0xad   :  { %1483 = vmatprep.subr.bf16.mxu0 %v1617_v51  ;;  %1532 = vmatprep.subr.bf16.mxu1 %v1782_v59 }
  0xb0   :  { %1484 = vmatpush3.bf16.msra.mxu0 %v1618_v52  ;;  %1533 = vmatpush3.bf16.msra.mxu1 %v1629_v62 }
  0xb1   :  { %1485 = vmatprep.subr.bf16.mxu0 %v1619_v28  ;;  %1534 = vmatprep.subr.bf16.mxu1 %v1782_v59 }
  0xb4   :  { %1486 = vmatpush3.bf16.msra.mxu0 %v1620_v53 }
  0xb5   :  { %1487 = vmatprep.subr.bf16.mxu0 %v1621_v54 }
  0xb8   :  { %1488 = vmatpush3.bf16.msra.mxu0 %v1622_v55 }
  0xb9   :  { %1489 = vmatprep.subr.bf16.mxu0 %v1623_v56 }
  0xbc   :  { %1490 = vmatpush3.bf16.msra.mxu0 %v1624_v57 }
  0xbd   :  { %1544 = vmatprep.subr.bf16.mxu0 %v1782_v59 }
 0x14a   :  { %v651_v11 = vpop.f32.mrb[0].mxu0  ;;  %v694_v13 = vpop.f32.mrb[0].mxu1 }
 0x14b   :  { %v652_v12 = vadd.f32 %v651_v11, %v159_v7  ;;  %v653_v14 = vpop.f32.mrb[1].mxu0  ;;  %v695_v15 = vadd.f32 %v694_v13, %v167_v8  ;;  %v696_v17 = vpop.f32.mrb[1].mxu1 }
 0x14c   :  { %v654_v16 = vadd.f32 %v653_v14, %v163_v9  ;;  %v655_v18 = vpop.f32.mrb[2].mxu0  ;;  %v697_v20 = vadd.f32 %v696_v17, %v171_v10  ;;  %v698_v22 = vpop.f32.mrb[2].mxu1 }
 0x14d   :  { %v789_v19 = vmax.f32 %v652_v12, 0.0  ;;  %v656_v21 = vadd.f32 %v655_v18, %v159_v7  ;;  %v657_v23 = vpop.f32.mrb[3].mxu0  ;;  %v791_v24 = vmax.f32 %v695_v15, 0.0  ;;  %v699_v26 = vadd.f32 %v698_v22, %v167_v8  ;;  %v700_v29 = vpop.f32.mrb[3].mxu1 }
 0x14e   :  { %v790_v25 = vmax.f32 %v654_v16, 0.0  ;;  %v658_v27 = vadd.f32 %v657_v23, %v163_v9  ;;  %v792_v30 = vmax.f32 %v697_v20, 0.0  ;;  %v701_v32 = vadd.f32 %v700_v29, %v171_v10  ;;  %v1630_v23 = vld [vmem:[#allocation8 + $0xa8] sm:$0xff]   ;;  %v1635_v29 = vld [vmem:[#allocation8 + $0xd0] sm:$0xff]  }
 0x14f   :  { %v797_v31 = vmax.f32 %v656_v21, 0.0  ;;  %v805_v33 = vmax.f32 %v789_v19, %v791_v24  ;;  %v799_v34 = vmax.f32 %v699_v26, 0.0  ;;  %1535 = vmatpush3.bf16.msra.mxu1 %v1630_v23  ;;  %v1631_v24 = vld [vmem:[#allocation8 + $0xb0] sm:$0xff]   ;;  %v1633_v26 = vld [vmem:[#allocation8 + $0xc0] sm:$0xff]  }
 0x150   :  { %v798_v35 = vmax.f32 %v658_v27, 0.0  ;;  %v806_v36 = vmax.f32 %v790_v25, %v792_v30  ;;  %v800_v38 = vmax.f32 %v701_v32, 0.0  ;;  %1536 = vmatprep.subr.bf16.mxu1 %v1782_v59  ;;  %v1632_v25 = vld [vmem:[#allocation8 + $0xb8] sm:$0xff]   ;;  %v1634_v27 = vld [vmem:[#allocation8 + $0xc8] sm:$0xff]  }
 0x151   :  { %v807_v39 = vmax.f32 %v797_v31, %v799_v34  ;;  %v1636_v30 = vld [vmem:[#allocation8 + $0xd8] sm:$0xff]   ;;  %v1637_v31 = vld [vmem:[#allocation8 + $0xe0] sm:$0xff]   ;;  %v1638_v32 = vld [vmem:[#allocation8 + $0xe8] sm:$0xff]  }
 0x152   :  { %v808_v40 = vmax.f32 %v798_v35, %v800_v38 }
 0x153   :  { %1537 = vmatpush3.bf16.msra.mxu1 %v1631_v24 }
 0x154   :  { %1538 = vmatprep.subr.bf16.mxu1 %v1782_v59 }
 0x157   :  { %1539 = vmatpush3.bf16.msra.mxu1 %v1632_v25 }
 0x158   :  { %1564 = vmatprep.subr.bf16.mxu1 %v1782_v59 }
 0x172   :  { %v737_v49 = vpop.f32.mrb[4].mxu0  ;;  %v780_v6 = vpop.f32.mrb[4].mxu1 }
 0x173   :  { %v738_v50 = vadd.f32 %v737_v49, %v175_v45  ;;  %v739_v51 = vpop.f32.mrb[5].mxu0  ;;  %v781_v52 = vadd.f32 %v780_v6, %v183_v46  ;;  %v782_v53 = vpop.f32.mrb[5].mxu1  ;;  %v1642_v49 = vld [vmem:[#allocation8 + $0x108] sm:$0xff]   ;;  %v1644_v6 = vld [vmem:[#allocation8 + $0x118] sm:$0xff]  }
 0x174   :  { %v740_v28 = vadd.f32 %v739_v51, %v179_v47  ;;  %v741_v54 = vpop.f32.mrb[6].mxu0  ;;  %v783_v56 = vadd.f32 %v782_v53, %v187_v48  ;;  %v784_v58 = vpop.f32.mrb[6].mxu1 }
 0x175   :  { %v793_v55 = vmax.f32 %v738_v50, 0.0  ;;  %v742_v57 = vadd.f32 %v741_v54, %v175_v45  ;;  %v743_v60 = vpop.f32.mrb[7].mxu0  ;;  %v795_v37 = vmax.f32 %v781_v52, 0.0  ;;  %v785_v62 = vadd.f32 %v784_v58, %v183_v46  ;;  %v786_v7 = vpop.f32.mrb[7].mxu1  ;;  %v1643_v50 = vld [vmem:[#allocation8 + $0x110] sm:$0xff]  }
 0x176   :  { %v794_v61 = vmax.f32 %v740_v28, 0.0  ;;  %v744_v63 = vadd.f32 %v743_v60, %v179_v47  ;;  %v796_v8 = vmax.f32 %v783_v56, 0.0  ;;  %v787_v9 = vadd.f32 %v786_v7, %v187_v48  ;;  %v1639_v47 = vld [vmem:[#allocation8 + $0xf0] sm:$0xff]   ;;  %v1640_v48 = vld [vmem:[#allocation8 + $0xf8] sm:$0xff]  }
 0x177   :  { %v801_v2 = vmax.f32 %v742_v57, 0.0  ;;  %v809_v10 = vmax.f32 %v793_v55, %v795_v37  ;;  %v803_v11 = vmax.f32 %v785_v62, 0.0  ;;  %v1645_v37 = vld [vmem:[#allocation8 + $0x120] sm:$0xff]   ;;  %v1647_v62 = vld [vmem:[#allocation8 + $0x130] sm:$0xff]  }
 0x178   :  { %v802_v12 = vmax.f32 %v744_v63, 0.0  ;;  %v810_v13 = vmax.f32 %v794_v61, %v796_v8  ;;  %v804_v14 = vmax.f32 %v787_v9, 0.0  ;;  %v1646_v61 = vld [vmem:[#allocation8 + $0x128] sm:$0xff]  }
 0x179   :  { %v813_v15 = vmax.f32 %v805_v33, %v809_v10  ;;  %v811_v16 = vmax.f32 %v801_v2, %v803_v11  ;;  %v1941_v33 = vld [vmem:[%s1984_s4] sm:$0xf]  ;;  %s1784_s4 = smov [#allocation10]  }
 0x17a   :  { %v814_v17 = vmax.f32 %v806_v36, %v810_v13  ;;  %v812_v18 = vmax.f32 %v802_v12, %v804_v14  ;;  %v854_v35 = vrot.slane %v1941_v33, %v158_v1  ;;  %v1641_v1 = vld [vmem:[#allocation8 + $0x100] sm:$0xff]   ;;  %v1014_v51 = vrot.slane %v1941_v33, %v162_v4  ;;  %v1648_v4 = vld [vmem:[#allocation8 + $0x138] sm:$0xff]   ;;  %s1335_s21 = sshll.u32 %s1784_s4, 4  ;;  %s1336_s21 = int_to_ptr.vmem [resolvable:$true] %s1335_s21 }
 0x17b   :  { %v815_v19 = vmax.f32 %v807_v39, %v811_v16  ;;  %v1126_v63 = vrot.slane %v1941_v33, %v166_v3  ;;  %s1741_s22 = scalar_lea.vmem %s1336_s21, 256  ;;  %p1746_p5 = scmp.lt.s32.totalorder %s1336_s21, %s1336_s21 }
 0x17c   :  { %v816_v20 = vmax.f32 %v808_v40, %v812_v18  ;;  %p1742_p4 = scmp.ne.s32.totalorder %s1336_s21, %s1741_s22  ;;  %p1747_p6 = scmp.lt.s32.totalorder %s1741_s22, %s1741_s22 }
 0x17d   :  { %v817_v21 = vpack.c.bf16 %v815_v19, %v813_v15 }
 0x17e   :  { %v818_v22 = vpack.c.bf16 %v816_v20, %v814_v17  ;;  %p1748_p7 = por %p1747_p6, %p1746_p5 }
 0x180   :  { %983 = vmatprep.mubr.bf16.mxu0 %v818_v22  ;;  %p1749_p8 = pnand %p1748_p7, %p1742_p4 }
 0x181   :  { %984 = vmatmul.mubr.bf16.vlgmr.msra.gmra.mrb[8].mxu0 %v817_v21 }
 0x182   :  { %1560 = vmatprep.mubr.msk.bf16.mxu0 %vm1783_vm3, %v1782_v59  ;;  %1545 = vmatpush3.bf16.msra.mxu0 %v1633_v26 }
 0x183   :  { %1546 = vmatprep.subr.bf16.mxu0 %v1782_v59 }
 0x186   :  { %1547 = vmatpush3.bf16.msra.mxu0 %v1634_v27 }
 0x187   :  { %1548 = vmatprep.subr.bf16.mxu0 %v1782_v59 }
 0x18a   :  { %1549 = vmatpush3.bf16.msra.mxu0 %v1635_v29 }
 0x18b   :  { %1550 = vmatprep.subr.bf16.mxu0 %v1782_v59 }
 0x18e   :  { %1551 = vmatpush3.bf16.msra.mxu0 %v1636_v30 }
 0x18f   :  { %1552 = vmatprep.subr.bf16.mxu0 %v1782_v59 }
 0x192   :  { %1553 = vmatpush3.bf16.msra.mxu0 %v1637_v31 }
 0x193   :  { %1554 = vmatprep.subr.bf16.mxu0 %v1782_v59 }
 0x196   :  { %1555 = vmatpush3.bf16.msra.mxu0 %v1638_v32 }
 0x197   :  { %1556 = vmatprep.subr.bf16.mxu0 %v1782_v59 }
 0x19a   :  { %1557 = vmatpush3.bf16.msra.mxu0 %v1639_v47 }
 0x19b   :  { %1558 = vmatprep.subr.bf16.mxu0 %v1782_v59 }
 0x19e   :  { %1559 = vmatpush3.bf16.msra.mxu0 %v1640_v48 }
 0x254   :  { %v1491_v34 = vpop.f32.mrb[8].mxu0 }
 0x255   :  { %v1492_v36 = vpop.f32.mrb[9].mxu0 }
 0x256   :  { %v1493_v38 = vadd.f32 %v1492_v36, %v1491_v34  ;;  %v1494_v39 = vpop.f32.mrb[10].mxu0 }
 0x257   :  { %v1495_v40 = vpop.f32.mrb[11].mxu0 }
 0x258   :  { %v986_v41 = vadd.f32 %v1493_v38, %v854_v35  ;;  %v1496_v42 = vadd.f32 %v1495_v40, %v1494_v39 }
 0x25a   :  { %v989_v43 = vadd.f32 %v1496_v42, %v854_v35  ;;  %v992_v44 = vmax.f32 %v986_v41, 0.0 }
 0x25c   :  { %v993_v45 = vmax.f32 %v989_v43, 0.0 }
 0x25e   :  { %v994_v46 = vpack.c.bf16 %v993_v45, %v992_v44 }
 0x260   :  { %1541 = vmatmul.mubr.bf16.vlgmr.msra.gmra.mrb[8].mxu1 %v994_v46 }
 0x261   :  { %1580 = vmatprep.mubr.msk.bf16.mxu1 %vm1783_vm3, %v1782_v59  ;;  %1565 = vmatpush3.bf16.msra.mxu1 %v1641_v1 }
 0x262   :  { %1566 = vmatprep.subr.bf16.mxu1 %v1782_v59 }
 0x265   :  { %1567 = vmatpush3.bf16.msra.mxu1 %v1642_v49 }
 0x266   :  { %1568 = vmatprep.subr.bf16.mxu1 %v1782_v59 }
 0x269   :  { %1569 = vmatpush3.bf16.msra.mxu1 %v1643_v50 }
 0x26a   :  { %1570 = vmatprep.subr.bf16.mxu1 %v1782_v59 }
 0x26d   :  { %1571 = vmatpush3.bf16.msra.mxu1 %v1644_v6 }
 0x26e   :  { %1572 = vmatprep.subr.bf16.mxu1 %v1782_v59 }
 0x271   :  { %1573 = vmatpush3.bf16.msra.mxu1 %v1645_v37 }
 0x272   :  { %1574 = vmatprep.subr.bf16.mxu1 %v1782_v59 }
 0x275   :  { %1575 = vmatpush3.bf16.msra.mxu1 %v1646_v61 }
 0x276   :  { %1576 = vmatprep.subr.bf16.mxu1 %v1782_v59 }
 0x279   :  { %1577 = vmatpush3.bf16.msra.mxu1 %v1647_v62 }
 0x27a   :  { %1578 = vmatprep.subr.bf16.mxu1 %v1782_v59  ;;  %v1238_v59 = vrot.slane %v1941_v33, %v170_v5 }
 0x27d   :  { %1579 = vmatpush3.bf16.msra.mxu1 %v1648_v4 }
 0x333   :  { %v1097_v52 = vpop.f32.mrb[8].mxu1 }
 0x334   :  { %v1098_v28 = vadd.f32 %v1097_v52, %v1014_v51  ;;  %v1542_v53 = vpop.f32.mrb[9].mxu1 }
 0x335   :  { %v1100_v54 = vpop.f32.mrb[10].mxu1 }
 0x336   :  { %v1101_v55 = vadd.f32 %v1100_v54, %v1014_v51  ;;  %v1543_v56 = vpop.f32.mrb[11].mxu1  ;;  %v1104_v57 = vmax.f32 %v1098_v28, 0.0 }
 0x338   :  { %v1105_v58 = vmax.f32 %v1101_v55, 0.0 }
 0x33a   :  { %v1106_v60 = vpack.c.bf16 %v1105_v58, %v1104_v57 }
 0x33c   :  { %1561 = vmatmul.mubr.bf16.vlgmr.msra.gmra.mrb[12].mxu0 %v1106_v60 }
 0x40f   :  { %v1209_v7 = vpop.f32.mrb[12].mxu0 }
 0x410   :  { %v1210_v8 = vadd.f32 %v1209_v7, %v1126_v63  ;;  %v1562_v2 = vpop.f32.mrb[13].mxu0 }
 0x411   :  { %v1212_v9 = vpop.f32.mrb[14].mxu0 }
 0x412   :  { %v1213_v10 = vadd.f32 %v1212_v9, %v1126_v63  ;;  %v1563_v11 = vpop.f32.mrb[15].mxu0  ;;  %1649 = vtanh.f32 %v1210_v8 }
 0x414   :  { %1651 = vtanh.f32 %v1213_v10 }
 0x41c   :  { %v1650_v12 = vpop.eup %1649 }
 0x41e   :  { %v1652_v13 = vpop.eup %1651 }
 0x41f   :  { %v1218_v14 = vpack.c.bf16 %v1652_v13, %v1650_v12 }
 0x421   :  { %1581 = vmatmul.mubr.bf16.vlgmr.msra.gmra.mrb[12].mxu1 %v1218_v14 }
 0x4f4   :  { %v1321_v15 = vpop.f32.mrb[12].mxu1 }
 0x4f5   :  { %v1322_v3 = vadd.f32 %v1321_v15, %v1238_v59  ;;  %v1582_v16 = vpop.f32.mrb[13].mxu1 }
 0x4f6   :  { %v1324_v17 = vpop.f32.mrb[14].mxu1 }
 0x4f7   :  { %1328 = vst [vmem:[#allocation10] sm:$0xff] %v1322_v3  ;;  %v1325_v18 = vadd.f32 %v1324_v17, %v1238_v59  ;;  %v1583_v19 = vpop.f32.mrb[15].mxu1 }
 0x4f9   :  { %1329 = vst [vmem:[#allocation10 + $0x8] sm:$0xff] %v1325_v18 }
 0x4fa   :  { %1752 = shalt.err (!%p1749_p8)
}
 0x4fb   :  { %s1753_s25 = scalar_lea.hbm %s1985_s5, 256 }
 0x4fc   :  { %p1754_p9 = scmp.ne.s32.totalorder %s1985_s5, %s1753_s25  ;;  %p1757_p10 = scmp.lt.u32.totalorder %s1753_s25, %s1985_s5 }
 0x4fe   :  { %p1759_p11 = pnand %p1757_p10, %p1754_p9 }
 0x500   :  { %1762 = shalt.err (!%p1759_p11)
}
 0x501   :  { %1341 = dma.vmem_to_hbm [thread:$0]  %s1336_s21, 256, %s1985_s5, [#allocation4], %s1775_s1, %s1775_s1, %s1776_s17  }
 0x502   :  { %1769 = dma.done.wait [#allocation4], 256  }
 0x503   :  { %1770 = vsyncadd [#allocation4], 4294967040 }
 0x504   :  { %1345 = vsyncpa [#allocation3], 1 }
 0x505   :  { %1346 = vsyncpa [#allocation6], 1 }
 0x506   :  { %1347 = vsyncpa [#allocation9], 1 }
 0x507   :  { %1348 = vsyncpa [#allocation4], 1 }

</bundles_post_ra>
